<compile_context>
chip_gen: v5e
topology: v5e:2x2
jax: 0.10.0
libtpu: 0.0.40
codegen_flags: <defaults>
</compile_context>

<pallas_src>
import functools

import jax
import jax.numpy as jnp
from jax.experimental import pallas as pl
from jax.experimental.pallas import tpu as pltpu

D = 16            # number of pieces (module default)
LANE = 128
SUB = 8
MAX_BLOCK_ROWS = 512   # (512, 128) f32 = 256 KiB per buffer; safe on all gens


def _pwl_kernel(tab_ref, x_ref, o_ref, *, d):
    """Elementwise piecewise-linear lookup.

    tab_ref: SMEM ref of shape (2, d+1): row 0 = cumsum table, row 1 = delta
             table where delta[k] = nw[min(k+1, d)].
    x_ref, o_ref: VMEM tiles of shape (block_rows, LANE).
    """
    x = x_ref[...].astype(jnp.float32)
    t = x * jnp.float32(d)
    t_trunc = jnp.trunc(t)          # torch .long() truncates toward 0 (x >= 0)
    frac = t - t_trunc              # torch .frac()

    # idx = min(trunc(t), d) is nondecreasing in t_trunc, so the 17-entry
    # "gather" is a monotone select chain: start at entry 0, then for each k
    # overwrite where t_trunc >= k.  One shared mask drives both tables
    # (1 vcmp + 2 vsel per step); the k = d step realizes the max-clamp.
    acc_cs = jnp.zeros_like(t) + tab_ref[0, 0]
    acc_d = jnp.zeros_like(t) + tab_ref[1, 0]
    for k in range(1, d + 1):
        mask = t_trunc >= jnp.float32(k)
        acc_cs = jnp.where(mask, tab_ref[0, k], acc_cs)
        acc_d = jnp.where(mask, tab_ref[1, k], acc_d)

    o_ref[...] = (acc_cs + frac * acc_d).astype(o_ref.dtype)


def init_weights(d=D):
    """Deterministic parameter init matching the PyTorch module."""
    w = jnp.ones((d + 1,), dtype=jnp.float32)
    w = w.at[0].set(0.0)
    return w


@functools.partial(jax.jit, static_argnames=("d",))
def piecewise_linear(x, weights, d=D):
    # --- tiny table precompute (fused into the jitted program) ---
    abs_w = jnp.abs(weights).astype(jnp.float32)
    nw = abs_w / abs_w.sum()
    cs = jnp.cumsum(nw)
    delta = jnp.concatenate([nw[1:], nw[d:d + 1]])   # delta[k] = nw[min(k+1, d)]
    table = jnp.stack([cs, delta])                   # (2, d+1), SMEM lookup table

    # --- flatten to a lane-dense (rows, 128) slab, padded to the block size ---
    orig_shape = x.shape
    flat = x.reshape(-1)
    n = flat.shape[0]
    rows_min = -(-n // LANE)
    rows8 = -(-rows_min // SUB) * SUB
    block_rows = min(MAX_BLOCK_ROWS, rows8)          # one block for small inputs
    rows = -(-rows8 // block_rows) * block_rows
    flat = jnp.pad(flat, (0, rows * LANE - n))
    x2 = flat.reshape(rows, LANE)
    grid = (rows // block_rows,)

    out2 = pl.pallas_call(
        functools.partial(_pwl_kernel, d=d),
        out_shape=jax.ShapeDtypeStruct(x2.shape, x.dtype),
        grid_spec=pltpu.PrefetchScalarGridSpec(
            num_scalar_prefetch=0,
            grid=grid,
            in_specs=[
                pl.BlockSpec(memory_space=pltpu.MemorySpace.SMEM),   # merged table
                pl.BlockSpec((block_rows, LANE), lambda i: (i, 0)),  # x tile
            ],
            out_specs=pl.BlockSpec((block_rows, LANE), lambda i: (i, 0)),
        ),
        compiler_params=pltpu.CompilerParams(
            dimension_semantics=("parallel",),       # megacore-shardable on v7x
        ),
        input_output_aliases={1: 0},                 # out2 reuses x2's HBM buffer
    )(table, x2)

    return out2.reshape(-1)[:n].reshape(orig_shape)


def piecewise_linear_ref(x, weights, d=D):
    """Pure-JAX reference mirroring the PyTorch forward exactly (x >= 0)."""
    abs_w = jnp.abs(weights)
    nw = abs_w / abs_w.sum()
    cs = jnp.cumsum(nw)
    t = x * d
    t_trunc = jnp.trunc(t)
    frac = t - t_trunc
    idx = t_trunc.astype(jnp.int32)
    lo = jnp.minimum(idx, d)
    hi = jnp.minimum(idx + 1, d)
    return jnp.take(cs, lo) + frac * jnp.take(nw, hi)


if __name__ == "__main__":
    key = jax.random.PRNGKey(0)
    # NCHW input (batch=2, channels=4, spatial=16x16), values in [0, 1) — the
    # module assumes non-negative inputs.
    x = jax.random.uniform(key, (2, 4, 16, 16), dtype=jnp.float32)
    weights = init_weights(D)

    out = piecewise_linear(x, weights, d=D)
    out = jax.block_until_ready(out)

    ref = piecewise_linear_ref(x, weights, d=D)
    assert out.shape == x.shape and out.dtype == x.dtype
    assert jnp.allclose(out, ref, atol=1e-6, rtol=1e-6), "mismatch vs reference"

    print("KERNEL_OK")
</pallas_src>

<mosaic_0001>
module attributes {stable_mosaic.version = 11 : i64} {
  func.func @_pwl_kernel(%arg0: i32, %arg1: memref<2x17xf32, #tpu.memory_space<smem>>, %arg2: memref<16x128xf32, #tpu.memory_space<vmem>>, %arg3: memref<16x128xf32, #tpu.memory_space<vmem>>) attributes {dimension_semantics = [#tpu.dimension_semantics<parallel>], iteration_bounds = array<i64: 1>, scalar_prefetch = 0 : i64, scratch_operands = 0 : i64, tpu.core_type = #tpu.core_type<tc>, window_params = [{transform_indices = @transform_0, window_bounds = array<i64: 2, 17>}, {transform_indices = @transform_1, window_bounds = array<i64: 16, 128>}, {transform_indices = @transform_2, window_bounds = array<i64: 16, 128>}]} {
    %c0 = arith.constant 0 : index
    %c0_0 = arith.constant 0 : index
    %0 = vector.load %arg2[%c0, %c0_0] : memref<16x128xf32, #tpu.memory_space<vmem>>, vector<16x128xf32>
    %cst = arith.constant 1.600000e+01 : f32
    %1 = vector.broadcast %cst : f32 to vector<16x128xf32>
    %2 = arith.mulf %0, %1 : vector<16x128xf32>
    %cst_1 = arith.constant 0.000000e+00 : f32
    %3 = vector.broadcast %cst_1 : f32 to vector<16x128xf32>
    %4 = arith.cmpf olt, %2, %3 : vector<16x128xf32>
    %5 = math.ceil %2 : vector<16x128xf32>
    %6 = math.floor %2 : vector<16x128xf32>
    %7 = arith.select %4, %5, %6 : vector<16x128xi1>, vector<16x128xf32>
    %8 = arith.subf %2, %7 : vector<16x128xf32>
    %cst_2 = arith.constant 0.000000e+00 : f32
    %9 = vector.broadcast %cst_2 : f32 to vector<16x128xf32>
    %c0_3 = arith.constant 0 : index
    %c0_4 = arith.constant 0 : index
    %10 = memref.load %arg1[%c0_3, %c0_4] : memref<2x17xf32, #tpu.memory_space<smem>>
    %11 = vector.broadcast %10 : f32 to vector<16x128xf32>
    %12 = arith.addf %9, %11 : vector<16x128xf32>
    %cst_5 = arith.constant 0.000000e+00 : f32
    %13 = vector.broadcast %cst_5 : f32 to vector<16x128xf32>
    %c1 = arith.constant 1 : index
    %c0_6 = arith.constant 0 : index
    %14 = memref.load %arg1[%c1, %c0_6] : memref<2x17xf32, #tpu.memory_space<smem>>
    %15 = vector.broadcast %14 : f32 to vector<16x128xf32>
    %16 = arith.addf %13, %15 : vector<16x128xf32>
    %cst_7 = arith.constant 1.000000e+00 : f32
    %17 = vector.broadcast %cst_7 : f32 to vector<16x128xf32>
    %18 = arith.cmpf oge, %7, %17 : vector<16x128xf32>
    %c0_8 = arith.constant 0 : index
    %c1_9 = arith.constant 1 : index
    %19 = memref.load %arg1[%c0_8, %c1_9] : memref<2x17xf32, #tpu.memory_space<smem>>
    %20 = vector.broadcast %19 : f32 to vector<16x128xf32>
    %21 = arith.select %18, %20, %12 : vector<16x128xi1>, vector<16x128xf32>
    %c1_10 = arith.constant 1 : index
    %c1_11 = arith.constant 1 : index
    %22 = memref.load %arg1[%c1_10, %c1_11] : memref<2x17xf32, #tpu.memory_space<smem>>
    %23 = vector.broadcast %22 : f32 to vector<16x128xf32>
    %24 = arith.select %18, %23, %16 : vector<16x128xi1>, vector<16x128xf32>
    %cst_12 = arith.constant 2.000000e+00 : f32
    %25 = vector.broadcast %cst_12 : f32 to vector<16x128xf32>
    %26 = arith.cmpf oge, %7, %25 : vector<16x128xf32>
    %c0_13 = arith.constant 0 : index
    %c2 = arith.constant 2 : index
    %27 = memref.load %arg1[%c0_13, %c2] : memref<2x17xf32, #tpu.memory_space<smem>>
    %28 = vector.broadcast %27 : f32 to vector<16x128xf32>
    %29 = arith.select %26, %28, %21 : vector<16x128xi1>, vector<16x128xf32>
    %c1_14 = arith.constant 1 : index
    %c2_15 = arith.constant 2 : index
    %30 = memref.load %arg1[%c1_14, %c2_15] : memref<2x17xf32, #tpu.memory_space<smem>>
    %31 = vector.broadcast %30 : f32 to vector<16x128xf32>
    %32 = arith.select %26, %31, %24 : vector<16x128xi1>, vector<16x128xf32>
    %cst_16 = arith.constant 3.000000e+00 : f32
    %33 = vector.broadcast %cst_16 : f32 to vector<16x128xf32>
    %34 = arith.cmpf oge, %7, %33 : vector<16x128xf32>
    %c0_17 = arith.constant 0 : index
    %c3 = arith.constant 3 : index
    %35 = memref.load %arg1[%c0_17, %c3] : memref<2x17xf32, #tpu.memory_space<smem>>
    %36 = vector.broadcast %35 : f32 to vector<16x128xf32>
    %37 = arith.select %34, %36, %29 : vector<16x128xi1>, vector<16x128xf32>
    %c1_18 = arith.constant 1 : index
    %c3_19 = arith.constant 3 : index
    %38 = memref.load %arg1[%c1_18, %c3_19] : memref<2x17xf32, #tpu.memory_space<smem>>
    %39 = vector.broadcast %38 : f32 to vector<16x128xf32>
    %40 = arith.select %34, %39, %32 : vector<16x128xi1>, vector<16x128xf32>
    %cst_20 = arith.constant 4.000000e+00 : f32
    %41 = vector.broadcast %cst_20 : f32 to vector<16x128xf32>
    %42 = arith.cmpf oge, %7, %41 : vector<16x128xf32>
    %c0_21 = arith.constant 0 : index
    %c4 = arith.constant 4 : index
    %43 = memref.load %arg1[%c0_21, %c4] : memref<2x17xf32, #tpu.memory_space<smem>>
    %44 = vector.broadcast %43 : f32 to vector<16x128xf32>
    %45 = arith.select %42, %44, %37 : vector<16x128xi1>, vector<16x128xf32>
    %c1_22 = arith.constant 1 : index
    %c4_23 = arith.constant 4 : index
    %46 = memref.load %arg1[%c1_22, %c4_23] : memref<2x17xf32, #tpu.memory_space<smem>>
    %47 = vector.broadcast %46 : f32 to vector<16x128xf32>
    %48 = arith.select %42, %47, %40 : vector<16x128xi1>, vector<16x128xf32>
    %cst_24 = arith.constant 5.000000e+00 : f32
    %49 = vector.broadcast %cst_24 : f32 to vector<16x128xf32>
    %50 = arith.cmpf oge, %7, %49 : vector<16x128xf32>
    %c0_25 = arith.constant 0 : index
    %c5 = arith.constant 5 : index
    %51 = memref.load %arg1[%c0_25, %c5] : memref<2x17xf32, #tpu.memory_space<smem>>
    %52 = vector.broadcast %51 : f32 to vector<16x128xf32>
    %53 = arith.select %50, %52, %45 : vector<16x128xi1>, vector<16x128xf32>
    %c1_26 = arith.constant 1 : index
    %c5_27 = arith.constant 5 : index
    %54 = memref.load %arg1[%c1_26, %c5_27] : memref<2x17xf32, #tpu.memory_space<smem>>
    %55 = vector.broadcast %54 : f32 to vector<16x128xf32>
    %56 = arith.select %50, %55, %48 : vector<16x128xi1>, vector<16x128xf32>
    %cst_28 = arith.constant 6.000000e+00 : f32
    %57 = vector.broadcast %cst_28 : f32 to vector<16x128xf32>
    %58 = arith.cmpf oge, %7, %57 : vector<16x128xf32>
    %c0_29 = arith.constant 0 : index
    %c6 = arith.constant 6 : index
    %59 = memref.load %arg1[%c0_29, %c6] : memref<2x17xf32, #tpu.memory_space<smem>>
    %60 = vector.broadcast %59 : f32 to vector<16x128xf32>
    %61 = arith.select %58, %60, %53 : vector<16x128xi1>, vector<16x128xf32>
    %c1_30 = arith.constant 1 : index
    %c6_31 = arith.constant 6 : index
    %62 = memref.load %arg1[%c1_30, %c6_31] : memref<2x17xf32, #tpu.memory_space<smem>>
    %63 = vector.broadcast %62 : f32 to vector<16x128xf32>
    %64 = arith.select %58, %63, %56 : vector<16x128xi1>, vector<16x128xf32>
    %cst_32 = arith.constant 7.000000e+00 : f32
    %65 = vector.broadcast %cst_32 : f32 to vector<16x128xf32>
    %66 = arith.cmpf oge, %7, %65 : vector<16x128xf32>
    %c0_33 = arith.constant 0 : index
    %c7 = arith.constant 7 : index
    %67 = memref.load %arg1[%c0_33, %c7] : memref<2x17xf32, #tpu.memory_space<smem>>
    %68 = vector.broadcast %67 : f32 to vector<16x128xf32>
    %69 = arith.select %66, %68, %61 : vector<16x128xi1>, vector<16x128xf32>
    %c1_34 = arith.constant 1 : index
    %c7_35 = arith.constant 7 : index
    %70 = memref.load %arg1[%c1_34, %c7_35] : memref<2x17xf32, #tpu.memory_space<smem>>
    %71 = vector.broadcast %70 : f32 to vector<16x128xf32>
    %72 = arith.select %66, %71, %64 : vector<16x128xi1>, vector<16x128xf32>
    %cst_36 = arith.constant 8.000000e+00 : f32
    %73 = vector.broadcast %cst_36 : f32 to vector<16x128xf32>
    %74 = arith.cmpf oge, %7, %73 : vector<16x128xf32>
    %c0_37 = arith.constant 0 : index
    %c8 = arith.constant 8 : index
    %75 = memref.load %arg1[%c0_37, %c8] : memref<2x17xf32, #tpu.memory_space<smem>>
    %76 = vector.broadcast %75 : f32 to vector<16x128xf32>
    %77 = arith.select %74, %76, %69 : vector<16x128xi1>, vector<16x128xf32>
    %c1_38 = arith.constant 1 : index
    %c8_39 = arith.constant 8 : index
    %78 = memref.load %arg1[%c1_38, %c8_39] : memref<2x17xf32, #tpu.memory_space<smem>>
    %79 = vector.broadcast %78 : f32 to vector<16x128xf32>
    %80 = arith.select %74, %79, %72 : vector<16x128xi1>, vector<16x128xf32>
    %cst_40 = arith.constant 9.000000e+00 : f32
    %81 = vector.broadcast %cst_40 : f32 to vector<16x128xf32>
    %82 = arith.cmpf oge, %7, %81 : vector<16x128xf32>
    %c0_41 = arith.constant 0 : index
    %c9 = arith.constant 9 : index
    %83 = memref.load %arg1[%c0_41, %c9] : memref<2x17xf32, #tpu.memory_space<smem>>
    %84 = vector.broadcast %83 : f32 to vector<16x128xf32>
    %85 = arith.select %82, %84, %77 : vector<16x128xi1>, vector<16x128xf32>
    %c1_42 = arith.constant 1 : index
    %c9_43 = arith.constant 9 : index
    %86 = memref.load %arg1[%c1_42, %c9_43] : memref<2x17xf32, #tpu.memory_space<smem>>
    %87 = vector.broadcast %86 : f32 to vector<16x128xf32>
    %88 = arith.select %82, %87, %80 : vector<16x128xi1>, vector<16x128xf32>
    %cst_44 = arith.constant 1.000000e+01 : f32
    %89 = vector.broadcast %cst_44 : f32 to vector<16x128xf32>
    %90 = arith.cmpf oge, %7, %89 : vector<16x128xf32>
    %c0_45 = arith.constant 0 : index
    %c10 = arith.constant 10 : index
    %91 = memref.load %arg1[%c0_45, %c10] : memref<2x17xf32, #tpu.memory_space<smem>>
    %92 = vector.broadcast %91 : f32 to vector<16x128xf32>
    %93 = arith.select %90, %92, %85 : vector<16x128xi1>, vector<16x128xf32>
    %c1_46 = arith.constant 1 : index
    %c10_47 = arith.constant 10 : index
    %94 = memref.load %arg1[%c1_46, %c10_47] : memref<2x17xf32, #tpu.memory_space<smem>>
    %95 = vector.broadcast %94 : f32 to vector<16x128xf32>
    %96 = arith.select %90, %95, %88 : vector<16x128xi1>, vector<16x128xf32>
    %cst_48 = arith.constant 1.100000e+01 : f32
    %97 = vector.broadcast %cst_48 : f32 to vector<16x128xf32>
    %98 = arith.cmpf oge, %7, %97 : vector<16x128xf32>
    %c0_49 = arith.constant 0 : index
    %c11 = arith.constant 11 : index
    %99 = memref.load %arg1[%c0_49, %c11] : memref<2x17xf32, #tpu.memory_space<smem>>
    %100 = vector.broadcast %99 : f32 to vector<16x128xf32>
    %101 = arith.select %98, %100, %93 : vector<16x128xi1>, vector<16x128xf32>
    %c1_50 = arith.constant 1 : index
    %c11_51 = arith.constant 11 : index
    %102 = memref.load %arg1[%c1_50, %c11_51] : memref<2x17xf32, #tpu.memory_space<smem>>
    %103 = vector.broadcast %102 : f32 to vector<16x128xf32>
    %104 = arith.select %98, %103, %96 : vector<16x128xi1>, vector<16x128xf32>
    %cst_52 = arith.constant 1.200000e+01 : f32
    %105 = vector.broadcast %cst_52 : f32 to vector<16x128xf32>
    %106 = arith.cmpf oge, %7, %105 : vector<16x128xf32>
    %c0_53 = arith.constant 0 : index
    %c12 = arith.constant 12 : index
    %107 = memref.load %arg1[%c0_53, %c12] : memref<2x17xf32, #tpu.memory_space<smem>>
    %108 = vector.broadcast %107 : f32 to vector<16x128xf32>
    %109 = arith.select %106, %108, %101 : vector<16x128xi1>, vector<16x128xf32>
    %c1_54 = arith.constant 1 : index
    %c12_55 = arith.constant 12 : index
    %110 = memref.load %arg1[%c1_54, %c12_55] : memref<2x17xf32, #tpu.memory_space<smem>>
    %111 = vector.broadcast %110 : f32 to vector<16x128xf32>
    %112 = arith.select %106, %111, %104 : vector<16x128xi1>, vector<16x128xf32>
    %cst_56 = arith.constant 1.300000e+01 : f32
    %113 = vector.broadcast %cst_56 : f32 to vector<16x128xf32>
    %114 = arith.cmpf oge, %7, %113 : vector<16x128xf32>
    %c0_57 = arith.constant 0 : index
    %c13 = arith.constant 13 : index
    %115 = memref.load %arg1[%c0_57, %c13] : memref<2x17xf32, #tpu.memory_space<smem>>
    %116 = vector.broadcast %115 : f32 to vector<16x128xf32>
    %117 = arith.select %114, %116, %109 : vector<16x128xi1>, vector<16x128xf32>
    %c1_58 = arith.constant 1 : index
    %c13_59 = arith.constant 13 : index
    %118 = memref.load %arg1[%c1_58, %c13_59] : memref<2x17xf32, #tpu.memory_space<smem>>
    %119 = vector.broadcast %118 : f32 to vector<16x128xf32>
    %120 = arith.select %114, %119, %112 : vector<16x128xi1>, vector<16x128xf32>
    %cst_60 = arith.constant 1.400000e+01 : f32
    %121 = vector.broadcast %cst_60 : f32 to vector<16x128xf32>
    %122 = arith.cmpf oge, %7, %121 : vector<16x128xf32>
    %c0_61 = arith.constant 0 : index
    %c14 = arith.constant 14 : index
    %123 = memref.load %arg1[%c0_61, %c14] : memref<2x17xf32, #tpu.memory_space<smem>>
    %124 = vector.broadcast %123 : f32 to vector<16x128xf32>
    %125 = arith.select %122, %124, %117 : vector<16x128xi1>, vector<16x128xf32>
    %c1_62 = arith.constant 1 : index
    %c14_63 = arith.constant 14 : index
    %126 = memref.load %arg1[%c1_62, %c14_63] : memref<2x17xf32, #tpu.memory_space<smem>>
    %127 = vector.broadcast %126 : f32 to vector<16x128xf32>
    %128 = arith.select %122, %127, %120 : vector<16x128xi1>, vector<16x128xf32>
    %cst_64 = arith.constant 1.500000e+01 : f32
    %129 = vector.broadcast %cst_64 : f32 to vector<16x128xf32>
    %130 = arith.cmpf oge, %7, %129 : vector<16x128xf32>
    %c0_65 = arith.constant 0 : index
    %c15 = arith.constant 15 : index
    %131 = memref.load %arg1[%c0_65, %c15] : memref<2x17xf32, #tpu.memory_space<smem>>
    %132 = vector.broadcast %131 : f32 to vector<16x128xf32>
    %133 = arith.select %130, %132, %125 : vector<16x128xi1>, vector<16x128xf32>
    %c1_66 = arith.constant 1 : index
    %c15_67 = arith.constant 15 : index
    %134 = memref.load %arg1[%c1_66, %c15_67] : memref<2x17xf32, #tpu.memory_space<smem>>
    %135 = vector.broadcast %134 : f32 to vector<16x128xf32>
    %136 = arith.select %130, %135, %128 : vector<16x128xi1>, vector<16x128xf32>
    %cst_68 = arith.constant 1.600000e+01 : f32
    %137 = vector.broadcast %cst_68 : f32 to vector<16x128xf32>
    %138 = arith.cmpf oge, %7, %137 : vector<16x128xf32>
    %c0_69 = arith.constant 0 : index
    %c16 = arith.constant 16 : index
    %139 = memref.load %arg1[%c0_69, %c16] : memref<2x17xf32, #tpu.memory_space<smem>>
    %140 = vector.broadcast %139 : f32 to vector<16x128xf32>
    %141 = arith.select %138, %140, %133 : vector<16x128xi1>, vector<16x128xf32>
    %c1_70 = arith.constant 1 : index
    %c16_71 = arith.constant 16 : index
    %142 = memref.load %arg1[%c1_70, %c16_71] : memref<2x17xf32, #tpu.memory_space<smem>>
    %143 = vector.broadcast %142 : f32 to vector<16x128xf32>
    %144 = arith.select %138, %143, %136 : vector<16x128xi1>, vector<16x128xf32>
    %145 = arith.mulf %8, %144 : vector<16x128xf32>
    %146 = arith.addf %141, %145 : vector<16x128xf32>
    %c0_72 = arith.constant 0 : index
    %c0_73 = arith.constant 0 : index
    %147 = vector.load %arg3[%c0_72, %c0_73] : memref<16x128xf32, #tpu.memory_space<vmem>>, vector<16x128xf32>
    tpu.vector_store %arg3[%c0_72, %c0_73], %146 {strides = array<i32>} : memref<16x128xf32, #tpu.memory_space<vmem>>, vector<16x128xf32>,
    return
  }
  func.func @transform_0(%arg0: i32) -> (i32, i32) {
    %c0_i32 = arith.constant 0 : i32
    %c0_i32_0 = arith.constant 0 : i32
    %c0_i32_1 = arith.constant 0 : i32
    return %c0_i32, %c0_i32_0 : i32, i32
  }
  func.func @transform_1(%arg0: i32) -> (i32, i32) {
    %c0_i32 = arith.constant 0 : i32
    %c0_i32_0 = arith.constant 0 : i32
    return %arg0, %c0_i32 : i32, i32
  }
  func.func @transform_2(%arg0: i32) -> (i32, i32) {
    %c0_i32 = arith.constant 0 : i32
    %c0_i32_0 = arith.constant 0 : i32
    return %arg0, %c0_i32 : i32, i32
  }
}

</mosaic_0001>

<bundles_post_ra>
// kernel: piecewise_linear.1
= control target key start
LH: loop header
LB: loop body
LE: loop exit
PB: predicated region body
PF: predicated region fallthrough
CT: control target
= control target key end

     0   :  { %7 = vsyncpa [#allocation3], 0  ;;  %s263_s12 = smov [#allocation2]   ;;  %s467_s0 = inlined_call_operand.vmem [shape: f32[2,17], index: 0, kind: input, shape index: {}]   ;;  %s468_s1 = inlined_call_operand.vmem [shape: f32[16,128], index: 1, kind: input, shape index: {}, may-alias: {1,2}]   ;;  %s469_s2 = inlined_call_operand.vmem [shape: f32[16,128], index: 2, kind: output, shape index: {}, may-alias: {1,2}]  }
   0x1   :  { %s13_s11 = sshll.u32 %s467_s0, 4  ;;  %s14_s11 = int_to_ptr.vmem [resolvable:$true] %s13_s11 }
   0x2   :  { %16 = dma.vmem_to_smem %s14_s11, 32, %s263_s12, [#allocation3]  }
   0x3   :  { %261 = dma.done.wait [#allocation3], 32  }
   0x4   :  { %262 = vsyncadd [#allocation3], 4294967264 }
   0x5   :  { %23 = sfence }
   0x6   :  { %v24_v0 = vld [vmem:[%s468_s1] sm:$0xff]  ;;  %v25_v1 = vld [vmem:[%s468_s1 + $0x8] sm:$0xff]  ;;  %s38_s17 = sld [smem:[#allocation2]] }
   0x7   :  { %v288_v2 = vmul.f32 16.0, %v24_v0  ;;  %v290_v3 = vmul.f32 16.0, %v25_v1  ;;  %s215_s0 = sld [smem:[#allocation2 + $0x80]] }
   0x8   :  { %s216_s18 = sld [smem:[#allocation2 + $0x1]] }
   0x9   :  { %vm28_vm0 = vcmp.lt.f32.partialorder %v288_v2, 0.0  ;;  %vm29_vm1 = vcmp.lt.f32.partialorder %v290_v3, 0.0  ;;  %v30_v4 = vceil.f32 %v288_v2  ;;  %v31_v5 = vceil.f32 %v290_v3  ;;  %s217_s19 = sld [smem:[#allocation2 + $0x81]] }
   0xa   :  { %v32_v6 = vfloor.f32 %v288_v2  ;;  %v33_v7 = vfloor.f32 %v290_v3  ;;  %s218_s1 = sld [smem:[#allocation2 + $0x2]] }
   0xb   :  { %s219_s20 = sld [smem:[#allocation2 + $0x82]] }
   0xc   :  { %v298_v8 = vsel %vm28_vm0, %v30_v4, %v32_v6  ;;  %v300_v9 = vsel %vm29_vm1, %v31_v5, %v33_v7  ;;  %v39_v10 = vstv %s38_s17  ;;  %s302_s21 = sld [smem:[#allocation2 + $0x3]] }
   0xd   :  { %v36_v11 = vsub.f32 %v288_v2, %v298_v8  ;;  %v42_v12 = vstv %s215_s0  ;;  %vm44_vm2 = vcmp.ge.f32.partialorder %v298_v8, 1.0  ;;  %s307_s22 = sld [smem:[#allocation2 + $0x83]]  ;;  %v37_v13 = vsub.f32 %v290_v3, %v300_v9 }
   0xe   :  { %vm45_vm3 = vcmp.ge.f32.partialorder %v300_v9, 1.0  ;;  %v47_v14 = vstv %s216_s18  ;;  %vm54_vm4 = vcmp.ge.f32.partialorder %v298_v8, 2.0  ;;  %s313_s23 = sld [smem:[#allocation2 + $0x4]]  ;;  %vm55_vm5 = vcmp.ge.f32.partialorder %v300_v9, 2.0 }
   0xf   :  { %v48_v15 = vsel %vm44_vm2, %v47_v14, %v39_v10  ;;  %v49_v16 = vsel %vm45_vm3, %v47_v14, %v39_v10  ;;  %v51_v17 = vstv %s217_s19  ;;  %s316_s24 = sld [smem:[#allocation2 + $0x84]]  ;;  %vm64_vm6 = vcmp.ge.f32.partialorder %v298_v8, 3.0 }
  0x10   :  { %v52_v18 = vsel %vm44_vm2, %v51_v17, %v42_v12  ;;  %v53_v19 = vsel %vm45_vm3, %v51_v17, %v42_v12  ;;  %v57_v20 = vstv %s218_s1  ;;  %s319_s25 = sld [smem:[#allocation2 + $0x5]]  ;;  %vm65_vm7 = vcmp.ge.f32.partialorder %v300_v9, 3.0 }
  0x11   :  { %v58_v21 = vsel %vm54_vm4, %v57_v20, %v48_v15  ;;  %v59_v22 = vsel %vm55_vm5, %v57_v20, %v49_v16  ;;  %v61_v23 = vstv %s219_s20  ;;  %s324_s26 = sld [smem:[#allocation2 + $0x85]]  ;;  %vm74_vm8 = vcmp.ge.f32.partialorder %v298_v8, 4.0 }
  0x12   :  { %v62_v24 = vsel %vm54_vm4, %v61_v23, %v52_v18  ;;  %v63_v25 = vsel %vm55_vm5, %v61_v23, %v53_v19  ;;  %v67_v26 = vstv %s302_s21  ;;  %s330_s27 = sld [smem:[#allocation2 + $0x6]]  ;;  %vm75_vm9 = vcmp.ge.f32.partialorder %v300_v9, 4.0 }
  0x13   :  { %v68_v27 = vsel %vm64_vm6, %v67_v26, %v58_v21  ;;  %v69_v28 = vsel %vm65_vm7, %v67_v26, %v59_v22  ;;  %v71_v29 = vstv %s307_s22  ;;  %s336_s28 = sld [smem:[#allocation2 + $0x86]]  ;;  %vm84_vm10 = vcmp.ge.f32.partialorder %v298_v8, 5.0 }
  0x14   :  { %v72_v30 = vsel %vm64_vm6, %v71_v29, %v62_v24  ;;  %v73_v31 = vsel %vm65_vm7, %v71_v29, %v63_v25  ;;  %v77_v32 = vstv %s313_s23  ;;  %s342_s29 = sld [smem:[#allocation2 + $0x7]]  ;;  %vm85_vm11 = vcmp.ge.f32.partialorder %v300_v9, 5.0 }
  0x15   :  { %v78_v33 = vsel %vm74_vm8, %v77_v32, %v68_v27  ;;  %v79_v34 = vsel %vm75_vm9, %v77_v32, %v69_v28  ;;  %v81_v35 = vstv %s316_s24  ;;  %s348_s30 = sld [smem:[#allocation2 + $0x87]]  ;;  %vm94_vm12 = vcmp.ge.f32.partialorder %v298_v8, 6.0 }
  0x16   :  { %v82_v36 = vsel %vm74_vm8, %v81_v35, %v72_v30  ;;  %v83_v37 = vsel %vm75_vm9, %v81_v35, %v73_v31  ;;  %v87_v38 = vstv %s319_s25  ;;  %s354_s3 = sld [smem:[#allocation2 + $0x8]]  ;;  %vm95_vm13 = vcmp.ge.f32.partialorder %v300_v9, 6.0 }
  0x17   :  { %v88_v39 = vsel %vm84_vm10, %v87_v38, %v78_v33  ;;  %v89_v40 = vsel %vm85_vm11, %v87_v38, %v79_v34  ;;  %v91_v41 = vstv %s324_s26  ;;  %s360_s4 = sld [smem:[#allocation2 + $0x88]]  ;;  %vm104_vm14 = vcmp.ge.f32.partialorder %v298_v8, 7.0 }
  0x18   :  { %v92_v42 = vsel %vm84_vm10, %v91_v41, %v82_v36  ;;  %v93_v43 = vsel %vm85_vm11, %v91_v41, %v83_v37  ;;  %v97_v44 = vstv %s330_s27  ;;  %s366_s5 = sld [smem:[#allocation2 + $0x9]]  ;;  %vm105_vm15 = vcmp.ge.f32.partialorder %v300_v9, 7.0 }
  0x19   :  { %v98_v45 = vsel %vm94_vm12, %v97_v44, %v88_v39  ;;  %v99_v46 = vsel %vm95_vm13, %v97_v44, %v89_v40  ;;  %v101_v47 = vstv %s336_s28  ;;  %s372_s6 = sld [smem:[#allocation2 + $0x89]]  ;;  %vm114_vm0 = vcmp.ge.f32.partialorder %v298_v8, 8.0 }
  0x1a   :  { %v102_v48 = vsel %vm94_vm12, %v101_v47, %v92_v42  ;;  %v103_v49 = vsel %vm95_vm13, %v101_v47, %v93_v43  ;;  %v107_v50 = vstv %s342_s29  ;;  %s378_s7 = sld [smem:[#allocation2 + $0xa]]  ;;  %vm115_vm1 = vcmp.ge.f32.partialorder %v300_v9, 8.0 }
  0x1b   :  { %v108_v51 = vsel %vm104_vm14, %v107_v50, %v98_v45  ;;  %v109_v52 = vsel %vm105_vm15, %v107_v50, %v99_v46  ;;  %v111_v53 = vstv %s348_s30  ;;  %s384_s8 = sld [smem:[#allocation2 + $0x8a]]  ;;  %vm124_vm2 = vcmp.ge.f32.partialorder %v298_v8, 9.0 }
  0x1c   :  { %v112_v54 = vsel %vm104_vm14, %v111_v53, %v102_v48  ;;  %v113_v55 = vsel %vm105_vm15, %v111_v53, %v103_v49  ;;  %v117_v56 = vstv %s354_s3  ;;  %s390_s9 = sld [smem:[#allocation2 + $0xb]]  ;;  %vm125_vm3 = vcmp.ge.f32.partialorder %v300_v9, 9.0 }
  0x1d   :  { %v118_v57 = vsel %vm114_vm0, %v117_v56, %v108_v51  ;;  %v119_v58 = vsel %vm115_vm1, %v117_v56, %v109_v52  ;;  %v121_v59 = vstv %s360_s4  ;;  %s396_s10 = sld [smem:[#allocation2 + $0x8b]]  ;;  %vm134_vm4 = vcmp.ge.f32.partialorder %v298_v8, 10.0 }
  0x1e   :  { %v122_v60 = vsel %vm114_vm0, %v121_v59, %v112_v54  ;;  %v123_v61 = vsel %vm115_vm1, %v121_v59, %v113_v55  ;;  %v127_v62 = vstv %s366_s5  ;;  %s402_s11 = sld [smem:[#allocation2 + $0xc]]  ;;  %vm135_vm5 = vcmp.ge.f32.partialorder %v300_v9, 10.0 }
  0x1f   :  { %v128_v63 = vsel %vm124_vm2, %v127_v62, %v118_v57  ;;  %v129_v0 = vsel %vm125_vm3, %v127_v62, %v119_v58  ;;  %v131_v1 = vstv %s372_s6  ;;  %s408_s12 = sld [smem:[#allocation2 + $0x8c]]  ;;  %vm144_vm6 = vcmp.ge.f32.partialorder %v298_v8, 11.0 }
  0x20   :  { %v132_v4 = vsel %vm124_vm2, %v131_v1, %v122_v60  ;;  %v133_v5 = vsel %vm125_vm3, %v131_v1, %v123_v61  ;;  %v137_v6 = vstv %s378_s7  ;;  %s414_s13 = sld [smem:[#allocation2 + $0xd]]  ;;  %vm145_vm7 = vcmp.ge.f32.partialorder %v300_v9, 11.0 }
  0x21   :  { %v138_v7 = vsel %vm134_vm4, %v137_v6, %v128_v63  ;;  %v139_v10 = vsel %vm135_vm5, %v137_v6, %v129_v0  ;;  %v141_v12 = vstv %s384_s8  ;;  %s420_s14 = sld [smem:[#allocation2 + $0x8d]]  ;;  %vm154_vm8 = vcmp.ge.f32.partialorder %v298_v8, 12.0 }
  0x22   :  { %v142_v14 = vsel %vm134_vm4, %v141_v12, %v132_v4  ;;  %v143_v15 = vsel %vm135_vm5, %v141_v12, %v133_v5  ;;  %v147_v16 = vstv %s390_s9  ;;  %s426_s15 = sld [smem:[#allocation2 + $0xe]]  ;;  %vm155_vm9 = vcmp.ge.f32.partialorder %v300_v9, 12.0 }
  0x23   :  { %v148_v17 = vsel %vm144_vm6, %v147_v16, %v138_v7  ;;  %v149_v18 = vsel %vm145_vm7, %v147_v16, %v139_v10  ;;  %v151_v19 = vstv %s396_s10  ;;  %s243_s16 = sld [smem:[#allocation2 + $0x8e]]  ;;  %vm164_vm10 = vcmp.ge.f32.partialorder %v298_v8, 13.0 }
  0x24   :  { %v152_v20 = vsel %vm144_vm6, %v151_v19, %v142_v14  ;;  %v153_v21 = vsel %vm145_vm7, %v151_v19, %v143_v15  ;;  %v157_v22 = vstv %s402_s11  ;;  %s244_s17 = sld [smem:[#allocation2 + $0xf]]  ;;  %vm165_vm11 = vcmp.ge.f32.partialorder %v300_v9, 13.0 }
  0x25   :  { %v158_v23 = vsel %vm154_vm8, %v157_v22, %v148_v17  ;;  %v159_v24 = vsel %vm155_vm9, %v157_v22, %v149_v18  ;;  %v161_v25 = vstv %s408_s12  ;;  %s245_s0 = sld [smem:[#allocation2 + $0x8f]]  ;;  %vm174_vm12 = vcmp.ge.f32.partialorder %v298_v8, 14.0 }
  0x26   :  { %v162_v26 = vsel %vm154_vm8, %v161_v25, %v152_v20  ;;  %v163_v27 = vsel %vm155_vm9, %v161_v25, %v153_v21  ;;  %v167_v28 = vstv %s414_s13  ;;  %s246_s18 = sld [smem:[#allocation2 + $0x10]]  ;;  %vm175_vm13 = vcmp.ge.f32.partialorder %v300_v9, 14.0 }
  0x27   :  { %v168_v29 = vsel %vm164_vm10, %v167_v28, %v158_v23  ;;  %v169_v30 = vsel %vm165_vm11, %v167_v28, %v159_v24  ;;  %v171_v31 = vstv %s420_s14  ;;  %s247_s19 = sld [smem:[#allocation2 + $0x90]]  ;;  %vm184_vm14 = vcmp.ge.f32.partialorder %v298_v8, 15.0 }
  0x28   :  { %v172_v32 = vsel %vm164_vm10, %v171_v31, %v162_v26  ;;  %v173_v33 = vsel %vm165_vm11, %v171_v31, %v163_v27  ;;  %v177_v34 = vstv %s426_s15  ;;  %vm185_vm15 = vcmp.ge.f32.partialorder %v300_v9, 15.0 }
  0x29   :  { %v178_v35 = vsel %vm174_vm12, %v177_v34, %v168_v29  ;;  %v179_v36 = vsel %vm175_vm13, %v177_v34, %v169_v30  ;;  %v181_v37 = vstv %s243_s16  ;;  %vm194_vm0 = vcmp.ge.f32.partialorder %v298_v8, 16.0 }
  0x2a   :  { %v182_v38 = vsel %vm174_vm12, %v181_v37, %v172_v32  ;;  %v183_v39 = vsel %vm175_vm13, %v181_v37, %v173_v33  ;;  %v187_v40 = vstv %s244_s17  ;;  %vm195_vm1 = vcmp.ge.f32.partialorder %v300_v9, 16.0 }
  0x2b   :  { %v188_v41 = vsel %vm184_vm14, %v187_v40, %v178_v35  ;;  %v189_v42 = vsel %vm185_vm15, %v187_v40, %v179_v36  ;;  %v191_v43 = vstv %s245_s0 }
  0x2c   :  { %v192_v44 = vsel %vm184_vm14, %v191_v43, %v182_v38  ;;  %v193_v45 = vsel %vm185_vm15, %v191_v43, %v183_v39  ;;  %v197_v46 = vstv %s246_s18 }
  0x2d   :  { %v201_v47 = vstv %s247_s19  ;;  %v198_v48 = vsel %vm194_vm0, %v197_v46, %v188_v41  ;;  %v199_v49 = vsel %vm195_vm1, %v197_v46, %v189_v42 }
  0x2e   :  { %v202_v50 = vsel %vm194_vm0, %v201_v47, %v192_v44  ;;  %v203_v51 = vsel %vm195_vm1, %v201_v47, %v193_v45 }
  0x2f   :  { %v204_v52 = vmul.f32 %v202_v50, %v36_v11  ;;  %v205_v53 = vmul.f32 %v203_v51, %v37_v13 }
  0x31   :  { %v206_v54 = vadd.f32 %v204_v52, %v198_v48  ;;  %v207_v55 = vadd.f32 %v205_v53, %v199_v49 }
  0x33   :  { %208 = vst [vmem:[%s469_s2] sm:$0xff] %v206_v54 }
  0x34   :  { %209 = vst [vmem:[%s469_s2 + $0x8] sm:$0xff] %v207_v55 }
  0x35   :  { %214 = vsyncpa [#allocation3], 1 }

</bundles_post_ra>
